<compile_context>
chip_gen: v7x
topology: tpu7x:2x2x1
jax: 0.10.0
libtpu: 0.0.40
codegen_flags: <defaults>
</compile_context>

<pallas_src>
import jax
import jax.numpy as jnp
from jax.experimental import pallas as pl
from jax.experimental.pallas import tpu as pltpu


def _leaky_relu(x):
    # F.leaky_relu default negative_slope = 0.01
    return jnp.where(x > 0, x, 0.01 * x)


def wcompute_kernel(xi_ref, xj_ref, wid_ref,
                    w1_ref, b1_ref, w2_ref, b2_ref, w3_ref, b3_ref,
                    w4_ref, b4_ref, w5_ref, b5_ref,
                    out_ref):
    xi = xi_ref[0]                 # (TI, F) row tile (the "i" nodes)
    xj = xj_ref[0]                 # (N,  F) all nodes (the "j" axis, softmax axis)
    wid = wid_ref[0]               # (TI, N)
    TI, F = xi.shape
    N = xj.shape[0]

    # Pairwise |x_i - x_j| for this row tile, flattened to a (TI*N, F) bf16 MXU operand.
    diff = jnp.abs(xi[:, None, :] - xj[None, :, :]).astype(jnp.bfloat16)
    h = diff.reshape(TI * N, F)

    # conv2d_1 .. conv2d_3: bf16 x bf16 -> f32 matmul, leaky_relu in f32, recast to bf16.
    for w_ref, b_ref in ((w1_ref, b1_ref), (w2_ref, b2_ref), (w3_ref, b3_ref)):
        a = jnp.dot(h, w_ref[...], preferred_element_type=jnp.float32) + b_ref[...]
        h = _leaky_relu(a).astype(jnp.bfloat16)

    # conv2d_4: keep the result in f32 — it feeds a VPU reduction, not the MXU.
    a = jnp.dot(h, w4_ref[...], preferred_element_type=jnp.float32) + b4_ref[...]
    h4 = _leaky_relu(a)                                          # (TI*N, nf) f32

    # conv2d_last (num_operators == 1): width-1 projection as a VPU/XLU reduction on the
    # (TI, N, nf) view -> logits land directly in the (TI, N) layout.
    w5 = w5_ref[...][:, 0]                                       # (nf,) f32
    s = jnp.sum(h4.reshape(TI, N, -1) * w5, axis=-1) + b5_ref[...]   # (TI, N)

    # activation == 'softmax': mask via W_id (matches torch's `- W_id * 1e8`), softmax over j.
    s = s - wid * 1e8
    m = jnp.max(s, axis=-1, keepdims=True)
    p = jnp.exp(s - m)
    denom = jnp.sum(p, axis=-1, keepdims=True)
    out_ref[0] = p * pl.reciprocal(denom, approx=True)


def _row_tile(N, F, hidden_dims, budget_bytes=8 << 20):
    """Pick the i-row tile so per-step intermediates stay well under the scoped VMEM
    default on every generation (v5e scopes 16 MiB; v7x has only 64 MiB physical)."""
    # Rough bytes of in-kernel intermediates per row of i:
    # bf16 pairwise features + (bf16 + f32) hidden activations + f32 logits/softmax temps.
    per_row = N * (2 * F + sum(6 * h for h in hidden_dims) + 4 * 4)
    ti = max(1, budget_bytes // max(per_row, 1))
    if ti >= N:
        return N
    return max(8, (ti // 8) * 8)   # keep the sublane dim a multiple of 8


def wcompute(x, w_id, params):
    """x: (B, N, F) f32, w_id: (B, N, N, 1) f32 -> (B, N, N, 2) f32 (operator='J2')."""
    B, N, F = x.shape
    (w1, b1), (w2, b2), (w3, b3), (w4, b4), (w5, b5) = params
    hidden = [w1.shape[1], w2.shape[1], w3.shape[1], w4.shape[1]]

    TI = _row_tile(N, F, hidden)
    grid = (B, pl.cdiv(N, TI))

    # bf16 MXU operands for the four hidden-layer matmuls; biases and the final width-1
    # projection stay f32 (it runs as a VPU reduction inside the kernel).
    w1b, w2b, w3b, w4b = (w.astype(jnp.bfloat16) for w in (w1, w2, w3, w4))
    wid2d = w_id[..., 0]                 # lane-dense (B, N, N) view of W_id

    def full_spec(arr):
        nd = arr.ndim
        return pl.BlockSpec(arr.shape, lambda b, i: (0,) * nd)

    in_specs = [
        pl.BlockSpec((1, TI, F), lambda b, i: (b, i, 0)),   # x_i row tile
        pl.BlockSpec((1, N, F), lambda b, i: (b, 0, 0)),    # x_j full (resident across i)
        pl.BlockSpec((1, TI, N), lambda b, i: (b, i, 0)),   # W_id row tile (lane-dense)
        full_spec(w1b), full_spec(b1),
        full_spec(w2b), full_spec(b2),
        full_spec(w3b), full_spec(b3),
        full_spec(w4b), full_spec(b4),
        full_spec(w5), full_spec(b5),
    ]
    out_specs = pl.BlockSpec((1, TI, N), lambda b, i: (b, i, 0))

    sm = pl.pallas_call(
        wcompute_kernel,
        out_shape=jax.ShapeDtypeStruct((B, N, N), jnp.float32),
        grid_spec=pltpu.PrefetchScalarGridSpec(
            num_scalar_prefetch=0,
            grid=grid,
            in_specs=in_specs,
            out_specs=out_specs,
        ),
        compiler_params=pltpu.CompilerParams(
            dimension_semantics=("parallel", "parallel")),
    )(x, x, wid2d, w1b, b1, w2b, b2, w3b, b3, w4b, b4, w5, b5)

    # operator == 'J2': concat [W_id, W_new] on the operator axis — done in JAX so the
    # kernel's stores stay lane-dense.
    return jnp.concatenate([w_id, sm[..., None]], axis=-1)


def init_params(key, input_features, nf, ratio=(2, 2, 1, 1), num_operators=1):
    """Deterministic init; 1x1 conv weights stored as (in, out), biases as (1, out)."""
    dims = [input_features,
            int(nf * ratio[0]), int(nf * ratio[1]),
            nf * ratio[2], nf * ratio[3],
            num_operators]
    params = []
    for i in range(5):
        key, kw, kb = jax.random.split(key, 3)
        fan_in = dims[i]
        w = jax.random.normal(kw, (dims[i], dims[i + 1]), jnp.float32) / jnp.sqrt(fan_in)
        b = 0.01 * jax.random.normal(kb, (1, dims[i + 1]), jnp.float32)
        params.append((w, b))
    return params


def wcompute_reference(x, w_id, params, matmul_dtype=jnp.float32):
    """Pure-JAX reference matching the PyTorch forward (eval mode).

    matmul_dtype lets us also build a bf16-matmul-matched reference to tightly check the
    kernel, which uses bf16 MXU operands with f32 accumulation.
    """
    (w1, b1), (w2, b2), (w3, b3), (w4, b4), (w5, b5) = params
    diff = jnp.abs(x[:, :, None, :] - x[:, None, :, :])          # (B, N, N, F)
    h = diff
    for (w, b) in [(w1, b1), (w2, b2), (w3, b3), (w4, b4)]:
        h = jnp.einsum('bijf,fo->bijo',
                       h.astype(matmul_dtype), w.astype(matmul_dtype),
                       preferred_element_type=jnp.float32) + b
        h = jnp.where(h > 0, h, 0.01 * h)
    s = jnp.einsum('bijf,fo->bijo', h, w5,
                   preferred_element_type=jnp.float32) + b5      # (B, N, N, 1)
    s = s - w_id * 1e8
    sm = jax.nn.softmax(s[..., 0], axis=-1)[..., None]
    return jnp.concatenate([w_id, sm], axis=-1)


if __name__ == "__main__":
    B, N, F, NF = 2, 8, 32, 16

    key = jax.random.PRNGKey(0)
    key, kx = jax.random.split(key)
    x = jax.random.normal(kx, (B, N, F), jnp.float32)
    w_id = jnp.tile(jnp.eye(N, dtype=jnp.float32)[None, :, :, None], (B, 1, 1, 1))

    params = init_params(jax.random.PRNGKey(1), F, NF)

    out = jax.block_until_ready(wcompute(x, w_id, params))
    assert out.shape == (B, N, N, 2), out.shape

    # Tight check vs a reference with matching bf16 matmul operands (covers tiling/softmax
    # logic; slack allows for the approx EUP reciprocal).
    ref_bf16 = wcompute_reference(x, w_id, params, matmul_dtype=jnp.bfloat16)
    assert jnp.allclose(out, ref_bf16, atol=1e-2, rtol=1e-2), "mismatch vs bf16-matched reference"

    # Loose check vs the pure-f32 reference (bf16 MXU inputs + approx reciprocal drift only).
    ref_f32 = wcompute_reference(x, w_id, params, matmul_dtype=jnp.float32)
    assert jnp.allclose(out, ref_f32, atol=5e-2, rtol=5e-2), "mismatch vs f32 reference"

    print("KERNEL_OK")
</pallas_src>

<mosaic_0001>
module attributes {stable_mosaic.version = 11 : i64} {
  func.func @wcompute_kernel(%arg0: i32, %arg1: i32, %arg2: memref<1x8x32xf32, #tpu.memory_space<vmem>>, %arg3: memref<1x8x32xf32, #tpu.memory_space<vmem>>, %arg4: memref<1x8x8xf32, #tpu.memory_space<vmem>>, %arg5: memref<32x32xbf16, #tpu.memory_space<vmem>>, %arg6: memref<1x32xf32, #tpu.memory_space<vmem>>, %arg7: memref<32x32xbf16, #tpu.memory_space<vmem>>, %arg8: memref<1x32xf32, #tpu.memory_space<vmem>>, %arg9: memref<32x16xbf16, #tpu.memory_space<vmem>>, %arg10: memref<1x16xf32, #tpu.memory_space<vmem>>, %arg11: memref<16x16xbf16, #tpu.memory_space<vmem>>, %arg12: memref<1x16xf32, #tpu.memory_space<vmem>>, %arg13: memref<16x1xf32, #tpu.memory_space<vmem>>, %arg14: memref<1x1xf32, #tpu.memory_space<vmem>>, %arg15: memref<1x8x8xf32, #tpu.memory_space<vmem>>) attributes {dimension_semantics = [#tpu.dimension_semantics<parallel>, #tpu.dimension_semantics<parallel>], iteration_bounds = array<i64: 2, 1>, scalar_prefetch = 0 : i64, scratch_operands = 0 : i64, tpu.core_type = #tpu.core_type<tc>, window_params = [{transform_indices = @transform_0, window_bounds = array<i64: 1, 8, 32>}, {transform_indices = @transform_1, window_bounds = array<i64: 1, 8, 32>}, {transform_indices = @transform_2, window_bounds = array<i64: 1, 8, 8>}, {pipeline_mode = #tpu.pipeline_mode<synchronous>, transform_indices = @transform_3, window_bounds = array<i64: 32, 32>}, {pipeline_mode = #tpu.pipeline_mode<synchronous>, transform_indices = @transform_4, window_bounds = array<i64: 1, 32>}, {pipeline_mode = #tpu.pipeline_mode<synchronous>, transform_indices = @transform_5, window_bounds = array<i64: 32, 32>}, {pipeline_mode = #tpu.pipeline_mode<synchronous>, transform_indices = @transform_6, window_bounds = array<i64: 1, 32>}, {pipeline_mode = #tpu.pipeline_mode<synchronous>, transform_indices = @transform_7, window_bounds = array<i64: 32, 16>}, {pipeline_mode = #tpu.pipeline_mode<synchronous>, transform_indices = @transform_8, window_bounds = array<i64: 1, 16>}, {pipeline_mode = #tpu.pipeline_mode<synchronous>, transform_indices = @transform_9, window_bounds = array<i64: 16, 16>}, {pipeline_mode = #tpu.pipeline_mode<synchronous>, transform_indices = @transform_10, window_bounds = array<i64: 1, 16>}, {pipeline_mode = #tpu.pipeline_mode<synchronous>, transform_indices = @transform_11, window_bounds = array<i64: 16, 1>}, {pipeline_mode = #tpu.pipeline_mode<synchronous>, transform_indices = @transform_12, window_bounds = array<i64: 1, 1>}, {transform_indices = @transform_13, window_bounds = array<i64: 1, 8, 8>}]} {
    %c0 = arith.constant 0 : index
    %c0_0 = arith.constant 0 : index
    %c0_1 = arith.constant 0 : index
    %0 = vector.load %arg2[%c0, %c0_0, %c0_1] : memref<1x8x32xf32, #tpu.memory_space<vmem>>, vector<1x8x32xf32>
    %1 = vector.shape_cast %0 : vector<1x8x32xf32> to vector<8x32xf32>
    %c0_2 = arith.constant 0 : index
    %c0_3 = arith.constant 0 : index
    %c0_4 = arith.constant 0 : index
    %2 = vector.load %arg3[%c0_2, %c0_3, %c0_4] : memref<1x8x32xf32, #tpu.memory_space<vmem>>, vector<1x8x32xf32>
    %3 = vector.shape_cast %2 : vector<1x8x32xf32> to vector<8x32xf32>
    %c0_5 = arith.constant 0 : index
    %c0_6 = arith.constant 0 : index
    %c0_7 = arith.constant 0 : index
    %4 = vector.load %arg4[%c0_5, %c0_6, %c0_7] : memref<1x8x8xf32, #tpu.memory_space<vmem>>, vector<1x8x8xf32>
    %5 = vector.shape_cast %4 : vector<1x8x8xf32> to vector<8x8xf32>
    %6 = vector.shape_cast %1 : vector<8x32xf32> to vector<8x1x32xf32>
    %7 = vector.shape_cast %3 : vector<8x32xf32> to vector<1x8x32xf32>
    %8 = vector.broadcast %6 : vector<8x1x32xf32> to vector<8x8x32xf32>
    %9 = vector.broadcast %7 : vector<1x8x32xf32> to vector<8x8x32xf32>
    %10 = arith.subf %8, %9 : vector<8x8x32xf32>
    %11 = math.absf %10 : vector<8x8x32xf32>
    %12 = arith.truncf %11 : vector<8x8x32xf32> to vector<8x8x32xbf16>
    %13 = vector.shape_cast %12 : vector<8x8x32xbf16> to vector<64x32xbf16>
    %c0_8 = arith.constant 0 : index
    %c0_9 = arith.constant 0 : index
    %14 = vector.load %arg5[%c0_8, %c0_9] : memref<32x32xbf16, #tpu.memory_space<vmem>>, vector<32x32xbf16>
    %cst = arith.constant dense<0.000000e+00> : vector<64x32xf32>
    %15 = tpu.matmul %13, %14, %cst {dimension_numbers = #tpu.dot_dimension_numbers<[1], [0], [0], [1], [0, 0, 1, 1], [], []>} : vector<64x32xbf16>, vector<32x32xbf16>, vector<64x32xf32> -> vector<64x32xf32>
    %c0_10 = arith.constant 0 : index
    %c0_11 = arith.constant 0 : index
    %16 = vector.load %arg6[%c0_10, %c0_11] : memref<1x32xf32, #tpu.memory_space<vmem>>, vector<1x32xf32>
    %17 = vector.broadcast %16 : vector<1x32xf32> to vector<64x32xf32>
    %18 = arith.addf %15, %17 : vector<64x32xf32>
    %cst_12 = arith.constant 0.000000e+00 : f32
    %19 = vector.broadcast %cst_12 : f32 to vector<64x32xf32>
    %20 = arith.cmpf ogt, %18, %19 : vector<64x32xf32>
    %cst_13 = arith.constant 0.00999999977 : f32
    %21 = vector.broadcast %cst_13 : f32 to vector<64x32xf32>
    %22 = arith.mulf %21, %18 : vector<64x32xf32>
    %23 = arith.select %20, %18, %22 : vector<64x32xi1>, vector<64x32xf32>
    %24 = arith.truncf %23 : vector<64x32xf32> to vector<64x32xbf16>
    %c0_14 = arith.constant 0 : index
    %c0_15 = arith.constant 0 : index
    %25 = vector.load %arg7[%c0_14, %c0_15] : memref<32x32xbf16, #tpu.memory_space<vmem>>, vector<32x32xbf16>
    %cst_16 = arith.constant dense<0.000000e+00> : vector<64x32xf32>
    %26 = tpu.matmul %24, %25, %cst_16 {dimension_numbers = #tpu.dot_dimension_numbers<[1], [0], [0], [1], [0, 0, 1, 1], [], []>} : vector<64x32xbf16>, vector<32x32xbf16>, vector<64x32xf32> -> vector<64x32xf32>
    %c0_17 = arith.constant 0 : index
    %c0_18 = arith.constant 0 : index
    %27 = vector.load %arg8[%c0_17, %c0_18] : memref<1x32xf32, #tpu.memory_space<vmem>>, vector<1x32xf32>
    %28 = vector.broadcast %27 : vector<1x32xf32> to vector<64x32xf32>
    %29 = arith.addf %26, %28 : vector<64x32xf32>
    %cst_19 = arith.constant 0.000000e+00 : f32
    %30 = vector.broadcast %cst_19 : f32 to vector<64x32xf32>
    %31 = arith.cmpf ogt, %29, %30 : vector<64x32xf32>
    %cst_20 = arith.constant 0.00999999977 : f32
    %32 = vector.broadcast %cst_20 : f32 to vector<64x32xf32>
    %33 = arith.mulf %32, %29 : vector<64x32xf32>
    %34 = arith.select %31, %29, %33 : vector<64x32xi1>, vector<64x32xf32>
    %35 = arith.truncf %34 : vector<64x32xf32> to vector<64x32xbf16>
    %c0_21 = arith.constant 0 : index
    %c0_22 = arith.constant 0 : index
    %36 = vector.load %arg9[%c0_21, %c0_22] : memref<32x16xbf16, #tpu.memory_space<vmem>>, vector<32x16xbf16>
    %cst_23 = arith.constant dense<0.000000e+00> : vector<64x16xf32>
    %37 = tpu.matmul %35, %36, %cst_23 {dimension_numbers = #tpu.dot_dimension_numbers<[1], [0], [0], [1], [0, 0, 1, 1], [], []>} : vector<64x32xbf16>, vector<32x16xbf16>, vector<64x16xf32> -> vector<64x16xf32>
    %c0_24 = arith.constant 0 : index
    %c0_25 = arith.constant 0 : index
    %38 = vector.load %arg10[%c0_24, %c0_25] : memref<1x16xf32, #tpu.memory_space<vmem>>, vector<1x16xf32>
    %39 = vector.broadcast %38 : vector<1x16xf32> to vector<64x16xf32>
    %40 = arith.addf %37, %39 : vector<64x16xf32>
    %cst_26 = arith.constant 0.000000e+00 : f32
    %41 = vector.broadcast %cst_26 : f32 to vector<64x16xf32>
    %42 = arith.cmpf ogt, %40, %41 : vector<64x16xf32>
    %cst_27 = arith.constant 0.00999999977 : f32
    %43 = vector.broadcast %cst_27 : f32 to vector<64x16xf32>
    %44 = arith.mulf %43, %40 : vector<64x16xf32>
    %45 = arith.select %42, %40, %44 : vector<64x16xi1>, vector<64x16xf32>
    %46 = arith.truncf %45 : vector<64x16xf32> to vector<64x16xbf16>
    %c0_28 = arith.constant 0 : index
    %c0_29 = arith.constant 0 : index
    %47 = vector.load %arg11[%c0_28, %c0_29] : memref<16x16xbf16, #tpu.memory_space<vmem>>, vector<16x16xbf16>
    %cst_30 = arith.constant dense<0.000000e+00> : vector<64x16xf32>
    %48 = tpu.matmul %46, %47, %cst_30 {dimension_numbers = #tpu.dot_dimension_numbers<[1], [0], [0], [1], [0, 0, 1, 1], [], []>} : vector<64x16xbf16>, vector<16x16xbf16>, vector<64x16xf32> -> vector<64x16xf32>
    %c0_31 = arith.constant 0 : index
    %c0_32 = arith.constant 0 : index
    %49 = vector.load %arg12[%c0_31, %c0_32] : memref<1x16xf32, #tpu.memory_space<vmem>>, vector<1x16xf32>
    %50 = vector.broadcast %49 : vector<1x16xf32> to vector<64x16xf32>
    %51 = arith.addf %48, %50 : vector<64x16xf32>
    %cst_33 = arith.constant 0.000000e+00 : f32
    %52 = vector.broadcast %cst_33 : f32 to vector<64x16xf32>
    %53 = arith.cmpf ogt, %51, %52 : vector<64x16xf32>
    %cst_34 = arith.constant 0.00999999977 : f32
    %54 = vector.broadcast %cst_34 : f32 to vector<64x16xf32>
    %55 = arith.mulf %54, %51 : vector<64x16xf32>
    %56 = arith.select %53, %51, %55 : vector<64x16xi1>, vector<64x16xf32>
    %c0_35 = arith.constant 0 : index
    %c0_36 = arith.constant 0 : index
    %57 = vector.load %arg13[%c0_35, %c0_36] : memref<16x1xf32, #tpu.memory_space<vmem>>, vector<16x1xf32>
    %58 = vector.shape_cast %57 : vector<16x1xf32> to vector<16xf32>
    %59 = vector.shape_cast %56 : vector<64x16xf32> to vector<8x8x16xf32>
    %60 = vector.shape_cast %58 : vector<16xf32> to vector<1x1x16xf32>
    %61 = vector.broadcast %60 : vector<1x1x16xf32> to vector<8x8x16xf32>
    %62 = arith.mulf %59, %61 : vector<8x8x16xf32>
    %cst_37 = arith.constant dense<0.000000e+00> : vector<8x8xf32>
    %63 = vector.multi_reduction <add>, %62, %cst_37 [2] : vector<8x8x16xf32> to vector<8x8xf32>
    %c0_38 = arith.constant 0 : index
    %c0_39 = arith.constant 0 : index
    %64 = vector.load %arg14[%c0_38, %c0_39] : memref<1x1xf32, #tpu.memory_space<vmem>>, vector<1x1xf32>
    %65 = vector.broadcast %64 : vector<1x1xf32> to vector<8x8xf32>
    %66 = arith.addf %63, %65 : vector<8x8xf32>
    %cst_40 = arith.constant 1.000000e+08 : f32
    %67 = vector.broadcast %cst_40 : f32 to vector<8x8xf32>
    %68 = arith.mulf %5, %67 : vector<8x8xf32>
    %69 = arith.subf %66, %68 : vector<8x8xf32>
    %cst_41 = arith.constant dense<0xFF800000> : vector<8xf32>
    %70 = vector.multi_reduction <maximumf>, %69, %cst_41 [1] : vector<8x8xf32> to vector<8xf32>
    %71 = vector.shape_cast %70 : vector<8xf32> to vector<8x1xf32>
    %72 = vector.broadcast %71 : vector<8x1xf32> to vector<8x8xf32>
    %73 = arith.subf %69, %72 : vector<8x8xf32>
    %74 = math.exp %73 : vector<8x8xf32>
    %cst_42 = arith.constant dense<0.000000e+00> : vector<8xf32>
    %75 = vector.multi_reduction <add>, %74, %cst_42 [1] : vector<8x8xf32> to vector<8xf32>
    %76 = vector.shape_cast %75 : vector<8xf32> to vector<8x1xf32>
    %77 = tpu.reciprocal %76 {approx = true} : vector<8x1xf32> -> vector<8x1xf32>
    %78 = vector.broadcast %77 : vector<8x1xf32> to vector<8x8xf32>
    %79 = arith.mulf %74, %78 : vector<8x8xf32>
    %c0_43 = arith.constant 0 : index
    %c0_44 = arith.constant 0 : index
    %c0_45 = arith.constant 0 : index
    %80 = vector.load %arg15[%c0_43, %c0_44, %c0_45] : memref<1x8x8xf32, #tpu.memory_space<vmem>>, vector<1x8x8xf32>
    %81 = vector.shape_cast %80 : vector<1x8x8xf32> to vector<8x8xf32>
    %82 = vector.shape_cast %79 : vector<8x8xf32> to vector<1x8x8xf32>
    tpu.vector_store %arg15[%c0_43, %c0_44, %c0_45], %82 {strides = array<i32>} : memref<1x8x8xf32, #tpu.memory_space<vmem>>, vector<1x8x8xf32>,
    return
  }
  func.func @transform_0(%arg0: i32, %arg1: i32) -> (i32, i32, i32) {
    %c0_i32 = arith.constant 0 : i32
    %c0_i32_0 = arith.constant 0 : i32
    return %arg0, %arg1, %c0_i32 : i32, i32, i32
  }
  func.func @transform_1(%arg0: i32, %arg1: i32) -> (i32, i32, i32) {
    %c0_i32 = arith.constant 0 : i32
    %c0_i32_0 = arith.constant 0 : i32
    %c0_i32_1 = arith.constant 0 : i32
    return %arg0, %c0_i32, %c0_i32_0 : i32, i32, i32
  }
  func.func @transform_2(%arg0: i32, %arg1: i32) -> (i32, i32, i32) {
    %c0_i32 = arith.constant 0 : i32
    %c0_i32_0 = arith.constant 0 : i32
    return %arg0, %arg1, %c0_i32 : i32, i32, i32
  }
  func.func @transform_3(%arg0: i32, %arg1: i32) -> (i32, i32) {
    %c0_i32 = arith.constant 0 : i32
    %c0_i32_0 = arith.constant 0 : i32
    %c0_i32_1 = arith.constant 0 : i32
    return %c0_i32, %c0_i32_0 : i32, i32
  }
  func.func @transform_4(%arg0: i32, %arg1: i32) -> (i32, i32) {
    %c0_i32 = arith.constant 0 : i32
    %c0_i32_0 = arith.constant 0 : i32
    %c0_i32_1 = arith.constant 0 : i32
    return %c0_i32, %c0_i32_0 : i32, i32
  }
  func.func @transform_5(%arg0: i32, %arg1: i32) -> (i32, i32) {
    %c0_i32 = arith.constant 0 : i32
    %c0_i32_0 = arith.constant 0 : i32
    %c0_i32_1 = arith.constant 0 : i32
    return %c0_i32, %c0_i32_0 : i32, i32
  }
  func.func @transform_6(%arg0: i32, %arg1: i32) -> (i32, i32) {
    %c0_i32 = arith.constant 0 : i32
    %c0_i32_0 = arith.constant 0 : i32
    %c0_i32_1 = arith.constant 0 : i32
    return %c0_i32, %c0_i32_0 : i32, i32
  }
  func.func @transform_7(%arg0: i32, %arg1: i32) -> (i32, i32) {
    %c0_i32 = arith.constant 0 : i32
    %c0_i32_0 = arith.constant 0 : i32
    %c0_i32_1 = arith.constant 0 : i32
    return %c0_i32, %c0_i32_0 : i32, i32
  }
  func.func @transform_8(%arg0: i32, %arg1: i32) -> (i32, i32) {
    %c0_i32 = arith.constant 0 : i32
    %c0_i32_0 = arith.constant 0 : i32
    %c0_i32_1 = arith.constant 0 : i32
    return %c0_i32, %c0_i32_0 : i32, i32
  }
  func.func @transform_9(%arg0: i32, %arg1: i32) -> (i32, i32) {
    %c0_i32 = arith.constant 0 : i32
    %c0_i32_0 = arith.constant 0 : i32
    %c0_i32_1 = arith.constant 0 : i32
    return %c0_i32, %c0_i32_0 : i32, i32
  }
  func.func @transform_10(%arg0: i32, %arg1: i32) -> (i32, i32) {
    %c0_i32 = arith.constant 0 : i32
    %c0_i32_0 = arith.constant 0 : i32
    %c0_i32_1 = arith.constant 0 : i32
    return %c0_i32, %c0_i32_0 : i32, i32
  }
  func.func @transform_11(%arg0: i32, %arg1: i32) -> (i32, i32) {
    %c0_i32 = arith.constant 0 : i32
    %c0_i32_0 = arith.constant 0 : i32
    %c0_i32_1 = arith.constant 0 : i32
    return %c0_i32, %c0_i32_0 : i32, i32
  }
  func.func @transform_12(%arg0: i32, %arg1: i32) -> (i32, i32) {
    %c0_i32 = arith.constant 0 : i32
    %c0_i32_0 = arith.constant 0 : i32
    %c0_i32_1 = arith.constant 0 : i32
    return %c0_i32, %c0_i32_0 : i32, i32
  }
  func.func @transform_13(%arg0: i32, %arg1: i32) -> (i32, i32, i32) {
    %c0_i32 = arith.constant 0 : i32
    %c0_i32_0 = arith.constant 0 : i32
    return %arg0, %arg1, %c0_i32 : i32, i32, i32
  }
}

</mosaic_0001>

<bundles_post_ra>
// kernel: tpu_custom_call.1
= control target key start
LH: loop header
LB: loop body
LE: loop exit
PB: predicated region body
PF: predicated region fallthrough
CT: control target
= control target key end

     0   :  { %s2668_s0 = inlined_call_operand.vmem [shape: f32[2,8,32], index: 0, kind: input, shape index: {}]   ;;  %s2669_s1 = inlined_call_operand.vmem [shape: f32[2,8,32], index: 1, kind: input, shape index: {}]   ;;  %s2670_s2 = inlined_call_operand.vmem [shape: f32[2,8,8], index: 2, kind: input, shape index: {}]   ;;  %s2671_s3 = inlined_call_operand.hbm [shape: bf16[32,32], index: 3, kind: input, shape index: {}]   ;;  %s2672_s4 = inlined_call_operand.vmem [shape: f32[1,32], index: 4, kind: input, shape index: {}]   ;;  %s2673_s5 = inlined_call_operand.hbm [shape: bf16[32,32], index: 5, kind: input, shape index: {}]   ;;  %s2674_s6 = inlined_call_operand.vmem [shape: f32[1,32], index: 6, kind: input, shape index: {}]   ;;  %s2675_s7 = inlined_call_operand.vmem [shape: bf16[32,16], index: 7, kind: input, shape index: {}]   ;;  %s2676_s8 = inlined_call_operand.vmem [shape: f32[1,16], index: 8, kind: input, shape index: {}]   ;;  %s2677_s9 = inlined_call_operand.vmem [shape: bf16[16,16], index: 9, kind: input, shape index: {}]   ;;  %s2678_s10 = inlined_call_operand.vmem [shape: f32[1,16], index: 10, kind: input, shape index: {}]   ;;  %s2679_s11 = inlined_call_operand.vmem [shape: f32[16,1], index: 11, kind: input, shape index: {}]   ;;  %s2680_s12 = inlined_call_operand.<no memory space> [shape: f32[1,1], index: 12, kind: input, shape index: {}]   ;;  %s2681_s13 = inlined_call_operand.hbm [shape: f32[2,8,8], index: 13, kind: output, shape index: {}]  }
   0x1   :  { %2694 = sst [smem:[#allocation19_spill]] %s2681_s13  ;;  %v18_v0 = vstv %s2680_s12 }
   0x2   :  { %19 = vst [vmem:[#allocation2] sm:$0x1] %v18_v0 }
   0x3   :  { %20 = vsyncpa [#allocation4], 0 }
   0x4   :  { %21 = vsyncpa [#allocation7], 0 }
   0x5   :  { %22 = vsyncpa [#allocation5], 0 }
   0x6   :  { %24 = vsyncpa [#allocation5 + $0x1], 0  ;;  %s2267_s27 = smov 0   ;;  %s2269_s28 = smov 0  }
   0x7   :  { %s2271_s29 = smov 0   ;;  %s2273_s30 = smov 0  }
   0x8   :  { %s2275_s14 = smov 0   ;;  %s2277_s15 = smov 0  }
   0x9 LB: > { %2695 = sst [smem:[#allocation12_spill]] %s2165_s27  ;;  %s1813_s12 = sadd.s32 4294967295, %s2185_s15   ;;  %s2185_s15 = sphi %s2277_s15, %s30_s15   ;;  %s2181_s14 = sphi %s2275_s14, %s2719_s14   ;;  %s2177_s30 = sphi %s2273_s30, %s2718_s30   ;;  %s2173_s29 = sphi %s2271_s29, %s2717_s29   ;;  %s2169_s28 = sphi %s2269_s28, %s2721_s28   ;;  %s2165_s27 = sphi %s2267_s27, %s2720_s27  }
   0xa   : > { %2696 = sst [smem:[#allocation13_spill]] %s2173_s29  ;;  %s1814_s16 = sadd.s32 4294967294, %s2185_s15  }
   0xb   : > { %2697 = sst [smem:[#allocation14_spill]] %s2181_s14  ;;  %s42_s17 = sadd.s32 1, %s2181_s14 }
   0xc   : > { %2698 = sst [smem:[#allocation15_spill]] %s2185_s15  ;;  %s343_s18 = sadd.s32 1, %s2173_s29 }
   0xd   : > { %p44_p0 = scmp.ge.s32.totalorder %s42_s17, 2  ;;  %p353_p1 = scmp.ne.s32.totalorder %s2173_s29, %s2169_s28 }
   0xe   : > { %p354_p2 = scmp.eq.s32.totalorder %s1813_s12, 1  ;;  %p359_p3 = scmp.ne.s32.totalorder %s2169_s28, %s2165_s27 }
   0xf   : > { %s2723_s17 = smov (%p44_p0, %s42_s17), 0  ;;  %p360_p5 = scmp.eq.s32.totalorder %s1814_s16, 1 }
  0x10   : > { %2699 = sst [smem:[#allocation16_spill]] %s2723_s17  ;;  %p2307_p4 = por %p354_p2, %p353_p1 }
  0x11   : > { %s338_s20 = ssub.s32 %s2181_s14, %s2723_s17  ;;  %p1815_p6 = scmp.ge.s32.totalorder %s2185_s15, 1 }
  0x12   : > { %s2700_s19 = scalar_select %p2307_p4, 1, 0 }
  0x13   : > { %p341_p7 = scmp.eq.s32.totalorder %s338_s20, 0  ;;  %p2314_p8 = por %p360_p5, %p359_p3 }
  0x14   : > { %p367_p9 = scmp.lt.s32.totalorder %s2185_s15, 3  ;;  %p2326_p11 = scmp.eq.s32.totalorder %s1813_s12, 0 }
  0x15   : > { %s2701_s21 = scalar_select %p2314_p8, 1, 0 }
  0x16   : > { %s2320_s22 = scalar_select %p341_p7, %s2173_s29, %s343_s18  }
  0x17   : > { %2702 = sst [smem:[#allocation17_spill]] %s2701_s21  ;;  %p2322_p10 = pnand %p1815_p6, %p367_p9 }
  0x18   : > { %2703 = sst [smem:[#allocation18_spill]] %s2320_s22  ;;  %s2187_s25 = smov [#allocation3]  }
  0x19   : > { %s2704_s23 = scalar_select %p2322_p10, 1, 0 }
  0x1a   : > { %s2705_s24 = scalar_select %p2326_p11, 1, 0 }
  0x1b   : > { %p1945_p12 = pneg %p2322_p10  ;;  %s379_s26 = sshll.u32 %s2187_s25, 4  ;;  %s380_s26 = int_to_ptr.vmem [resolvable:$true] %s379_s26 }
  0x1c   : > { %s2188_s18 = smov [#allocation6]   ;;  %s2043_s14 = scalar_lea.hbm %s2671_s3, 256 }
  0x1d   : > { %p2334_p13 = pnand %p2326_p11, %p1945_p12  ;;  %s395_s20 = sshll.u32 %s2188_s18, 4  ;;  %s2338_s20 = int_to_ptr.vmem [resolvable:$true] %s395_s20 }
  0x1e   : > { %p2044_p0 = scmp.ne.s32.totalorder %s2671_s3, %s2043_s14  ;;  %p2050_p5 = scmp.lt.u32.totalorder %s2043_s14, %s2671_s3 }
  0x1f   : > { %p2045_p1 = pneg %p2334_p13 }
  0x21   : > { %p2046_p2 = pnand %p2045_p1, %p2044_p0 }
  0x23   : > { %p2047_p3 = pneg %p2046_p2 }
  0x25   : > { %p2052_p6 = pnand %p2050_p5, %p2047_p3 }
  0x27   : > { %2055 = shalt.err (!%p2052_p6)
}
  0x28   : > { %s2056_s18 = scalar_lea.vmem %s380_s26, 256  ;;  %p2064_p8 = scmp.lt.s32.totalorder %s380_s26, %s380_s26 }
  0x29   : > { %p2057_p7 = scmp.ne.s32.totalorder %s380_s26, %s2056_s18  ;;  %p2065_p4 = scmp.lt.s32.totalorder %s2056_s18, %s2056_s18 }
  0x2b   : > { %p2059_p9 = pnand %p2057_p7, %p2045_p1  ;;  %p2066_p11 = por %p2065_p4, %p2064_p8 }
  0x2d   : > { %p2060_p12 = pneg %p2059_p9 }
  0x2f   : > { %p2067_p10 = pnand %p2066_p11, %p2060_p12 }
  0x31   : > { %2070 = shalt.err (!%p2067_p10)
}
  0x32   : > { %s2189_s29 = smov 64   ;;  %s2190_s17 = smov 4  }
  0x33   : > { %1948 = dma.hbm_to_vmem [thread:$0]  (!%p2334_p13), %s2671_s3, 256, %s380_s26, [#allocation4], %s2189_s29, %s2189_s29, %s2190_s17  }
  0x34   : > { %s2071_s25 = scalar_lea.hbm %s2673_s5, 256 }
  0x35   : > { %p2072_p0 = scmp.ne.s32.totalorder %s2673_s5, %s2071_s25  ;;  %p2078_p10 = scmp.lt.u32.totalorder %s2071_s25, %s2673_s5 }
  0x37   : > { %p2074_p4 = pnand %p2072_p0, %p2045_p1 }
  0x39   : > { %p2075_p8 = pneg %p2074_p4 }
  0x3b   : > { %p2080_p11 = pnand %p2078_p10, %p2075_p8 }
  0x3d   : > { %2083 = shalt.err (!%p2080_p11)
}
  0x3e   : > { %s2084_s26 = scalar_lea.vmem %s2338_s20, 256  ;;  %p2092_p6 = scmp.lt.s32.totalorder %s2338_s20, %s2338_s20 }
  0x3f   : > { %p2085_p2 = scmp.ne.s32.totalorder %s2338_s20, %s2084_s26  ;;  %p2093_p7 = scmp.lt.s32.totalorder %s2084_s26, %s2084_s26 }
  0x41   : > { %p2087_p3 = pnand %p2085_p2, %p2045_p1  ;;  %p2094_p9 = por %p2093_p7, %p2092_p6 }
  0x43   : > { %p2088_p5 = pneg %p2087_p3 }
  0x45   : > { %p2095_p12 = pnand %p2094_p9, %p2088_p5 }
  0x47   : > { %2098 = shalt.err (!%p2095_p12)
}
  0x48   : > { %1951 = dma.hbm_to_vmem [thread:$0]  (!%p2334_p13), %s2673_s5, 256, %s2338_s20, [#allocation7], %s2189_s29, %s2189_s29, %s2190_s17  }
  0x49   : > { %p2707_p0 = scmp.ne.s32.totalorder %s2704_s23, 0 }
  0x4a   : > { %p2708_p4 = scmp.ne.s32.totalorder (!%p2707_p0), %s2705_s24, 0 }
  0x4b   : > { %459 = sbr.rel (%p2707_p0) target bundleno = 1949 (0x79d), region = 72 }
  0x52   : > { %2152 = dma.done.wait (%p2708_p4), [#allocation4], 256  }
  0x53   : > { %2154 = vsyncadd (%p2708_p4), [#allocation4], 4294967040 }
  0x54   : > { %2156 = dma.done.wait (%p2708_p4), [#allocation7], 256  }
  0x55   : > { %2158 = vsyncadd (%p2708_p4), [#allocation7], 4294967040  ;;  %p520_p1 = scmp.lt.s32.totalorder %s2177_s30, 1  ;;  %v547_v1 = vlaneseq  ;;  %v2191_v2 = vmov 1966171168   ;;  %v2017_v7 = vld [vmem:[#allocation3] sm:$0xff]  }
  0x56   : > { %v545_v3 = vunpack.c.l.s4 %v2191_v2  ;;  %v2018_v8 = vld [vmem:[#allocation3 + $0x8] sm:$0xff]   ;;  %1889 = vmatprep.subr.bf16.mxu0 %v2017_v7  ;;  %vm699_vm0 = vcmask 261120   ;;  %v2020_v53 = vld [vmem:[#allocation6] sm:$0xff]   ;;  %v2021_v54 = vld [vmem:[#allocation6 + $0x8] sm:$0xff]   ;;  %s517_s26 = sand.u32 1, %s2169_s28   ;;  %s1859_s27 = sshll.u32 %s2177_s30, 7 }
  0x57   : > { %s521_s15 = scalar_select %p520_p1, %s2177_s30, 1  ;;  %v2400_v4 = vshrl.u32 %v547_v1, 7  ;;  %1890 = vmatpush3.bf16.msra.mxu0 %v2017_v7  ;;  %1901 = vmatprep.subr.bf16.mxu1 %v2020_v53  ;;  %v2022_v55 = vld [vmem:[%s2675_s7] sm:$0xff]  }
  0x58   : > { %v546_v5 = vunpack.c.0.s8 %v545_v3  ;;  %1891 = vmatprep.subr.bf16.mxu0 %v2018_v8  ;;  %1902 = vmatpush3.bf16.msra.mxu1 %v2020_v53  ;;  %v1826_v56 = vld [vmem:[%s2672_s4] ss:$0 sm:$0xff]  ;;  %s1822_s13 = sshll.u32 %s517_s26, 3  ;;  %s1679_s30 = scalar_lea.sflag [#allocation5], %s517_s26 }
  0x59   : > { %s2402_s23 = sshll.u32 %s521_s15, 3  ;;  %v2414_v12 = vsub.s32 0, %v2400_v4  ;;  %1903 = vmatprep.subr.bf16.mxu1 %v2021_v54  ;;  %s519_s15 = scalar_lea.vmem [#allocation8], %s1822_s13 }
  0x5a   : > { %s526_s24 = scalar_lea.vmem %s2668_s0, %s2402_s23  ;;  %v549_v6 = vsub.s32 %v546_v5, %v2400_v4  ;;  %s530_s14 = scalar_lea.vmem %s2669_s1, %s2402_s23 }
  0x5b   : > { %v539_v9 = vld [vmem:[%s526_s24] sm:$0xff]  ;;  %1892 = vmatpush3.bf16.msra.mxu0 %v2018_v8  ;;  %s537_s29 = scalar_lea.vmem %s2670_s2, %s2402_s23  ;;  %s1693_s16 = sshll.u32 %s519_s15, 4  ;;  %s2621_s16 = int_to_ptr.vmem [resolvable:$true] %s1693_s16 }
  0x5c   : > { %v543_v10 = vcombine.high %v539_v9, %v539_v9  ;;  %v550_v11 = vrot.slane %v539_v9, %v549_v6  ;;  %v540_v16 = vld [vmem:[%s530_s14] sm:$0xff]  ;;  %1904 = vmatpush3.bf16.msra.mxu1 %v2021_v54  ;;  %1913 = vmatprep.subr.bf16.mxu0 %v2022_v55  ;;  %s2099_s23 = scalar_lea.vmem %s2621_s16, 128  ;;  %p2711_p8 = scmp.ne.s32.totalorder %s2700_s19, 0 }
  0x5d   : > { %p2100_p13 = scmp.ne.s32.totalorder %s2621_s16, %s2099_s23  ;;  %s2193_s21 = smov [#allocation8]  }
  0x5e   : > { %v557_v13 = vrot.slane %v543_v10, %v549_v6  ;;  %v558_v14 = vcombine.high %v550_v11, %v550_v11  ;;  %v566_v15 = vrot.slane %v550_v11, %v549_v6  ;;  %s2103_s22 = sshll.u32 %s2193_s21, 4  ;;  %s2104_s22 = int_to_ptr.vmem [resolvable:$false] %s2103_s22 }
  0x5f   : > { %p2101_p10 = pnand %p2100_p13, %p2711_p8  ;;  %s2105_s12 = scalar_lea.vmem %s2104_s22, 256 }
  0x60   : > { %v580_v17 = vrot.slane %v558_v14, %v549_v6  ;;  %v588_v18 = vcombine.high %v566_v15, %v566_v15  ;;  %v595_v19 = vrot.slane %v566_v15, %v2414_v12  ;;  %v559_v20 = vcombine.high %v557_v13, %v557_v13  ;;  %p2106_p2 = scmp.lt.s32.totalorder %s2621_s16, %s2104_s22  ;;  %p2107_p3 = scmp.lt.s32.totalorder %s2105_s12, %s2099_s23 }
  0x61   : > { %v573_v21 = vrot.slane %v557_v13, %v549_v6  ;;  %p2102_p11 = pneg %p2101_p10 }
  0x62   : > { %v590_v22 = vcombine.high %v580_v17, %v580_v17  ;;  %v599_v23 = vrot.slane %v580_v17, %v2414_v12  ;;  %v632_v24 = vsub.f32 %v595_v19, %v540_v16  ;;  %v603_v25 = vrot.slane %v588_v18, %v2414_v12  ;;  %p2108_p5 = por %p2107_p3, %p2106_p2 }
  0x63   : > { %v587_v26 = vrot.slane %v559_v20, %v549_v6  ;;  %v611_v27 = vrot.slane %v573_v21, %v2414_v12  ;;  %v589_v28 = vcombine.high %v573_v21, %v573_v21 }
  0x64   : > { %v633_v29 = vsub.f32 %v599_v23, %v540_v16  ;;  %v640_v30 = vand.u32 2147483647, %v632_v24  ;;  %v607_v31 = vrot.slane %v590_v22, %v2414_v12  ;;  %v634_v32 = vsub.f32 %v603_v25, %v540_v16  ;;  %p2109_p6 = pnand %p2108_p5, %p2102_p11 }
  0x65   : > { %v615_v33 = vrot.slane %v587_v26, %v2414_v12  ;;  %v636_v34 = vsub.f32 %v611_v27, %v540_v16  ;;  %v591_v35 = vcombine.high %v587_v26, %v587_v26  ;;  %v619_v36 = vrot.slane %v589_v28, %v2414_v12 }
  0x66   : > { %v641_v37 = vand.u32 2147483647, %v633_v29  ;;  %v635_v38 = vsub.f32 %v607_v31, %v540_v16  ;;  %v642_v39 = vand.u32 2147483647, %v634_v32  ;;  %v2023_v32 = vld [vmem:[%s2675_s7 + $0x8] sm:$0xff]  }
  0x67   : > { %v637_v40 = vsub.f32 %v615_v33, %v540_v16  ;;  %v644_v41 = vand.u32 2147483647, %v636_v34  ;;  %v623_v42 = vrot.slane %v591_v35, %v2414_v12  ;;  %v638_v45 = vsub.f32 %v619_v36, %v540_v16  ;;  %v2024_v33 = vld [vmem:[%s2677_s9] sm:$0xff]  }
  0x68   : > { %v1862_v43 = vpack.c.bf16 %v641_v37, %v640_v30  ;;  %v643_v44 = vand.u32 2147483647, %v635_v38  ;;  %1925 = vmatprep.subr.bf16.mxu1 %v2024_v33  ;;  %v1837_v34 = vld [vmem:[%s2674_s6] ss:$0 sm:$0xff] }
  0x69   : > { %v645_v46 = vand.u32 2147483647, %v637_v40  ;;  %v639_v47 = vsub.f32 %v623_v42, %v540_v16  ;;  %v646_v50 = vand.u32 2147483647, %v638_v45 }
  0x6a   : > { %1893 = vmatprep.mubr.msk.bf16.mxu0 %vm699_vm0, %v1862_v43  ;;  %v1863_v48 = vpack.c.bf16 %v643_v44, %v642_v39 }
  0x6b   : > { %v1864_v49 = vpack.c.bf16 %v645_v46, %v644_v41  ;;  %v647_v51 = vand.u32 2147483647, %v639_v47 }
  0x6c   : > { %1894 = vmatmul.mubr.msk.bf16.vlgmr.msra.gmra.mrb[0].mxu0 %vm699_vm0, %v1863_v48 }
  0x6d   : > { %1897 = vmatprep.mubr.msk.bf16.mxu0 %vm699_vm0, %v1864_v49  ;;  %v1865_v52 = vpack.c.bf16 %v647_v51, %v646_v50  ;;  %1914 = vmatpush3.bf16.msra.mxu0 %v2022_v55 }
  0x6e   : > { %1915 = vmatprep.subr.bf16.mxu0 %v2023_v32 }
  0x71   : > { %1916 = vmatpush3.bf16.msra.mxu0 %v2023_v32 }
  0x74   : > { %1898 = vmatmul.mubr.msk.bf16.gmra.mrb[4].mxu0 %vm699_vm0, %v1865_v52 }
 0x13f   : > { %v1895_v57 = vpop.f32.mrb[0].mxu0 }
 0x140   : > { %v755_v58 = vadd.f32 %v1895_v57, %v1826_v56  ;;  %v746_v59 = vpop.f32.mrb[1].mxu0 }
 0x141   : > { %v747_v60 = vadd.f32 %v1826_v56, %v746_v59  ;;  %v1896_v61 = vpop.f32.mrb[2].mxu0 }
 0x142   : > { %v787_v62 = vmul.f32 0.01, %v755_v58  ;;  %v758_v63 = vadd.f32 %v1896_v61, %v1826_v56  ;;  %v749_v0 = vpop.f32.mrb[3].mxu0  ;;  %vm779_vm1 = vcmp.gt.f32.partialorder %v755_v58, 0.0 }
 0x143   : > { %v785_v2 = vmul.f32 0.01, %v747_v60  ;;  %v750_v3 = vadd.f32 %v1826_v56, %v749_v0  ;;  %vm777_vm3 = vcmp.gt.f32.partialorder %v747_v60, 0.0 }
 0x144   : > { %vm780_vm2 = vcmp.gt.f32.partialorder %v758_v63, 0.0  ;;  %v788_v5 = vmul.f32 0.01, %v758_v63  ;;  %v795_v7 = vsel %vm779_vm1, %v755_v58, %v787_v62 }
 0x145   : > { %v786_v6 = vmul.f32 0.01, %v750_v3  ;;  %vm778_vm4 = vcmp.gt.f32.partialorder %v750_v3, 0.0  ;;  %v793_v11 = vsel %vm777_vm3, %v747_v60, %v785_v2 }
 0x146   : > { %v796_v8 = vsel %vm780_vm2, %v758_v63, %v788_v5 }
 0x147   : > { %v802_v9 = vpack.c.bf16 %v796_v8, %v795_v7  ;;  %v1899_v10 = vpop.f32.mrb[4].mxu0  ;;  %v794_v13 = vsel %vm778_vm4, %v750_v3, %v786_v6 }
 0x148   : > { %v771_v14 = vadd.f32 %v1899_v10, %v1826_v56  ;;  %v762_v15 = vpop.f32.mrb[5].mxu0  ;;  %v801_v16 = vpack.c.bf16 %v794_v13, %v793_v11  ;;  %v1178_v11 = vld [vmem:[%s2679_s11] sm:$0xff] }
 0x149   : > { %v763_v17 = vadd.f32 %v1826_v56, %v762_v15  ;;  %v1900_v18 = vpop.f32.mrb[6].mxu0  ;;  %v1857_v13 = vld [vmem:[#allocation2] ss:$0 sm:$0xff]  ;;  %v2192_v15 = vmov 0  }
 0x14a   : > { %vm783_vm5 = vcmp.gt.f32.partialorder %v771_v14, 0.0  ;;  %v791_v19 = vmul.f32 0.01, %v771_v14  ;;  %v774_v20 = vadd.f32 %v1900_v18, %v1826_v56  ;;  %v765_v21 = vpop.f32.mrb[7].mxu0  ;;  %1905 = vmatprep.mubr.msk.bf16.mxu1 %vm699_vm0, %v801_v16  ;;  %2015 = vset.pattern.permute.xlu0 %v2192_v15  ;;  %v1179_v18 = vld [vmem:[%s2679_s11 + $0x8] sm:$0xff] }
 0x14b   : > { %vm781_vm6 = vcmp.gt.f32.partialorder %v763_v17, 0.0  ;;  %v789_v22 = vmul.f32 0.01, %v763_v17  ;;  %v766_v23 = vadd.f32 %v1826_v56, %v765_v21  ;;  %1906 = vmatmul.mubr.msk.bf16.vlgmr.msra.gmra.mrb[0].mxu1 %vm699_vm0, %v802_v9  ;;  %v541_v9 = vld [vmem:[%s537_s29] sm:$0xff]  ;;  %2016 = vset.pattern.permute.xlu1 %v2192_v15  ;;  %s2709_s29 = sld [smem:[#allocation19_spill]] }
 0x14c   : > { %v799_v24 = vsel %vm783_vm5, %v771_v14, %v791_v19  ;;  %vm784_vm7 = vcmp.gt.f32.partialorder %v774_v20, 0.0  ;;  %v792_v25 = vmul.f32 0.01, %v774_v20  ;;  %1926 = vmatpush3.bf16.msra.mxu1 %v2024_v33  ;;  %v2455_v10 = vmul.f32 1e+08, %v541_v9  ;;  %1183 = vperm.xlu0 %2015, %v1178_v11  }
 0x14d   : > { %v797_v26 = vsel %vm781_vm6, %v763_v17, %v789_v22  ;;  %vm782_vm8 = vcmp.gt.f32.partialorder %v766_v23, 0.0  ;;  %v790_v27 = vmul.f32 0.01, %v766_v23  ;;  %v2461_v14 = vsub.s32 1, %v2400_v4  ;;  %1254 = vperm.xlu1 %2016, %v1857_v13  }
 0x14e   : > { %v800_v28 = vsel %vm784_vm7, %v774_v20, %v792_v25  ;;  %v2466_v17 = vsub.s32 2, %v2400_v4  ;;  %v2474_v20 = vsub.s32 3, %v2400_v4  ;;  %v1270_v21 = vrot.slane %v2455_v10, %v2414_v12 }
 0x14f   : > { %v804_v29 = vpack.c.bf16 %v800_v28, %v799_v24  ;;  %v798_v30 = vsel %vm782_vm8, %v766_v23, %v790_v27  ;;  %v1277_v16 = vrot.slane %v2455_v10, %v2461_v14  ;;  %v2479_v22 = vsub.s32 5, %v2400_v4  ;;  %v1844_v27 = vld [vmem:[%s2676_s8] ss:$0 sm:$0xff] }
 0x150   : > { %v803_v31 = vpack.c.bf16 %v798_v30, %v797_v26  ;;  %1186 = vperm.xlu0 %2015, %v1179_v18   ;;  %v1284_v19 = vrot.slane %v2455_v10, %v2466_v17  ;;  %v1291_v23 = vrot.slane %v2455_v10, %v2474_v20  ;;  %v2484_v24 = vsub.s32 4, %v2400_v4 }
 0x151   : > { %1279 = vbcast.lane.b32.xlu1 %v1277_v16, 256  ;;  %v1305_v25 = vrot.slane %v2455_v10, %v2479_v22  ;;  %vm1076_vm5 = vcmask 130048   ;;  %s2710_s17 = smov %s2709_s29  ;;  %s2619_s14 = scalar_lea.hbm %s2709_s29, %s1859_s27 }
 0x152   : > { %1909 = vmatprep.mubr.msk.bf16.mxu1 %vm699_vm0, %v803_v31  ;;  %v1298_v26 = vrot.slane %v2455_v10, %v2484_v24 }
 0x153   : > { %1910 = vmatmul.mubr.msk.bf16.gmra.mrb[4].mxu1 %vm699_vm0, %v804_v29 }
 0x154   : > { %1272 = vbcast.lane.b32.xlu0 %v1270_v21, 256 }
 0x155   : > { %1286 = vbcast.lane.b32.xlu1 %v1284_v19, 256 }
 0x158   : > { %1307 = vbcast.lane.b32.xlu0 %v1305_v25, 256 }
 0x159   : > { %1293 = vbcast.lane.b32.xlu1 %v1291_v23, 256 }
 0x15d   : > { %1300 = vbcast.lane.b32.xlu1 %v1298_v26, 256 }
 0x21e   : > { %v1907_v35 = vpop.f32.mrb[0].mxu1 }
 0x21f   : > { %v883_v36 = vadd.f32 %v1907_v35, %v1837_v34  ;;  %v874_v37 = vpop.f32.mrb[1].mxu1 }
 0x220   : > { %v875_v38 = vadd.f32 %v1837_v34, %v874_v37  ;;  %v1908_v39 = vpop.f32.mrb[2].mxu1 }
 0x221   : > { %v915_v40 = vmul.f32 0.01, %v883_v36  ;;  %v886_v41 = vadd.f32 %v1908_v39, %v1837_v34  ;;  %v877_v42 = vpop.f32.mrb[3].mxu1  ;;  %vm907_vm9 = vcmp.gt.f32.partialorder %v883_v36, 0.0 }
 0x222   : > { %v913_v43 = vmul.f32 0.01, %v875_v38  ;;  %v878_v44 = vadd.f32 %v1837_v34, %v877_v42  ;;  %vm905_vm10 = vcmp.gt.f32.partialorder %v875_v38, 0.0 }
 0x223   : > { %vm908_vm11 = vcmp.gt.f32.partialorder %v886_v41, 0.0  ;;  %v916_v45 = vmul.f32 0.01, %v886_v41  ;;  %v923_v47 = vsel %vm907_vm9, %v883_v36, %v915_v40 }
 0x224   : > { %vm906_vm12 = vcmp.gt.f32.partialorder %v878_v44, 0.0  ;;  %v914_v46 = vmul.f32 0.01, %v878_v44  ;;  %v921_v49 = vsel %vm905_vm10, %v875_v38, %v913_v43  ;;  %vm1199_vm10 = vcmask 130112  }
 0x225   : > { %v924_v48 = vsel %vm908_vm11, %v886_v41, %v916_v45 }
 0x226   : > { %v930_v50 = vpack.c.bf16 %v924_v48, %v923_v47  ;;  %v922_v51 = vsel %vm906_vm12, %v878_v44, %v914_v46  ;;  %v1911_v52 = vpop.f32.mrb[4].mxu1 }
 0x227   : > { %v929_v53 = vpack.c.bf16 %v922_v51, %v921_v49  ;;  %v899_v54 = vadd.f32 %v1911_v52, %v1837_v34  ;;  %v890_v55 = vpop.f32.mrb[5].mxu1 }
 0x228   : > { %v891_v56 = vadd.f32 %v1837_v34, %v890_v55  ;;  %v1912_v57 = vpop.f32.mrb[6].mxu1 }
 0x229   : > { %v919_v58 = vmul.f32 0.01, %v899_v54  ;;  %v902_v59 = vadd.f32 %v1912_v57, %v1837_v34  ;;  %v893_v60 = vpop.f32.mrb[7].mxu1  ;;  %1917 = vmatprep.mubr.msk.bf16.mxu0 %vm699_vm0, %v929_v53  ;;  %vm911_vm13 = vcmp.gt.f32.partialorder %v899_v54, 0.0 }
 0x22a   : > { %v917_v61 = vmul.f32 0.01, %v891_v56  ;;  %v894_v62 = vadd.f32 %v1837_v34, %v893_v60  ;;  %1918 = vmatmul.mubr.msk.bf16.vlgmr.msra.gmra.mrb[8].mxu0 %vm699_vm0, %v930_v50  ;;  %vm909_vm14 = vcmp.gt.f32.partialorder %v891_v56, 0.0 }
 0x22b   : > { %vm912_vm15 = vcmp.gt.f32.partialorder %v902_v59, 0.0  ;;  %v920_v63 = vmul.f32 0.01, %v902_v59  ;;  %v927_v2 = vsel %vm911_vm13, %v899_v54, %v919_v58 }
 0x22c   : > { %vm910_vm1 = vcmp.gt.f32.partialorder %v894_v62, 0.0  ;;  %v918_v0 = vmul.f32 0.01, %v894_v62  ;;  %v925_v5 = vsel %vm909_vm14, %v891_v56, %v917_v61 }
 0x22d   : > { %v928_v3 = vsel %vm912_vm15, %v902_v59, %v920_v63 }
 0x22e   : > { %v932_v6 = vpack.c.bf16 %v928_v3, %v927_v2  ;;  %v926_v7 = vsel %vm910_vm1, %v894_v62, %v918_v0  ;;  %v1189_v0 = vand.u32 127, %v547_v1  ;;  %v1184_v2 = vpop.permute.xlu0 %1183 }
 0x22f   : > { %v931_v8 = vpack.c.bf16 %v926_v7, %v925_v5 }
 0x230   : > { %v1194_v3 = vadd.s32 4294967288, %v1189_v0  ;;  %v2499_v5 = vsub.s32 %v1189_v0, %v2400_v4 }
 0x231   : > { %1921 = vmatprep.mubr.msk.bf16.mxu0 %vm699_vm0, %v931_v8  ;;  %v1851_v8 = vld [vmem:[%s2678_s10] ss:$0 sm:$0xff] }
 0x232   : > { %1922 = vmatmul.mubr.msk.bf16.gmra.mrb[12].mxu0 %vm699_vm0, %v932_v6  ;;  %v1197_v6 = vsub.s32 %v1194_v3, %v2400_v4  ;;  %v1187_v7 = vpop.permute.xlu0 %1186  ;;  %v1193_v11 = vrot.slane %v1184_v2, %v2499_v5 }
 0x234   : > { %v1198_v13 = vrot.slane %v1187_v7, %v1197_v6  ;;  %v2520_v7 = vsub.s32 6, %v2400_v4 }
 0x2fd   : > { %v1919_v28 = vpop.f32.mrb[8].mxu0 }
 0x2fe   : > { %v1011_v29 = vadd.f32 %v1919_v28, %v1844_v27  ;;  %v1002_v30 = vpop.f32.mrb[9].mxu0 }
 0x2ff   : > { %v1003_v31 = vadd.f32 %v1844_v27, %v1002_v30  ;;  %v1920_v32 = vpop.f32.mrb[10].mxu0 }
 0x300   : > { %v1043_v33 = vmul.f32 0.01, %v1011_v29  ;;  %v1014_v34 = vadd.f32 %v1920_v32, %v1844_v27  ;;  %v1005_v35 = vpop.f32.mrb[11].mxu0  ;;  %vm1035_vm0 = vcmp.gt.f32.partialorder %v1011_v29, 0.0 }
 0x301   : > { %v1041_v36 = vmul.f32 0.01, %v1003_v31  ;;  %v1006_v37 = vadd.f32 %v1844_v27, %v1005_v35  ;;  %vm1033_vm2 = vcmp.gt.f32.partialorder %v1003_v31, 0.0 }
 0x302   : > { %vm1036_vm3 = vcmp.gt.f32.partialorder %v1014_v34, 0.0  ;;  %v1044_v38 = vmul.f32 0.01, %v1014_v34  ;;  %v1051_v40 = vsel %vm1035_vm0, %v1011_v29, %v1043_v33 }
 0x303   : > { %vm1034_vm4 = vcmp.gt.f32.partialorder %v1006_v37, 0.0  ;;  %v1042_v39 = vmul.f32 0.01, %v1006_v37  ;;  %v1049_v42 = vsel %vm1033_vm2, %v1003_v31, %v1041_v36 }
 0x304   : > { %v1052_v41 = vsel %vm1036_vm3, %v1014_v34, %v1044_v38  ;;  %vm1201_vm3 = vcmask 1041409  }
 0x305   : > { %v1058_v43 = vpack.c.bf16 %v1052_v41, %v1051_v40  ;;  %v1050_v44 = vsel %vm1034_vm4, %v1006_v37, %v1042_v39  ;;  %v1923_v45 = vpop.f32.mrb[12].mxu0  ;;  %vm1202_vm4 = vcmask 1042434  }
 0x306   : > { %v1057_v46 = vpack.c.bf16 %v1050_v44, %v1049_v42  ;;  %v1027_v47 = vadd.f32 %v1923_v45, %v1844_v27  ;;  %v1018_v48 = vpop.f32.mrb[13].mxu0 }
 0x307   : > { %v1019_v49 = vadd.f32 %v1844_v27, %v1018_v48  ;;  %v1924_v50 = vpop.f32.mrb[14].mxu0 }
 0x308   : > { %v1047_v51 = vmul.f32 0.01, %v1027_v47  ;;  %v1030_v52 = vadd.f32 %v1924_v50, %v1844_v27  ;;  %v1021_v53 = vpop.f32.mrb[15].mxu0  ;;  %1927 = vmatprep.mubr.msk.bf16.mxu1 %vm1076_vm5, %v1057_v46  ;;  %vm1039_vm6 = vcmp.gt.f32.partialorder %v1027_v47, 0.0 }
 0x309   : > { %v1045_v54 = vmul.f32 0.01, %v1019_v49  ;;  %v1022_v55 = vadd.f32 %v1844_v27, %v1021_v53  ;;  %1928 = vmatmul.mubr.msk.bf16.vlgmr.msra.gmra.mrb[8].mxu1 %vm1076_vm5, %v1058_v43  ;;  %vm1037_vm7 = vcmp.gt.f32.partialorder %v1019_v49, 0.0  ;;  %v1200_v27 = vsel %vm1199_vm10, %v1198_v13, %v1193_v11 }
 0x30a   : > { %vm1040_vm8 = vcmp.gt.f32.partialorder %v1030_v52, 0.0  ;;  %v1048_v56 = vmul.f32 0.01, %v1030_v52  ;;  %v1055_v58 = vsel %vm1039_vm6, %v1027_v47, %v1047_v51  ;;  %vm1206_vm6 = vcmask 1044484  }
 0x30b   : > { %vm1038_vm9 = vcmp.gt.f32.partialorder %v1022_v55, 0.0  ;;  %v1046_v57 = vmul.f32 0.01, %v1022_v55  ;;  %v1053_v60 = vsel %vm1037_vm7, %v1019_v49, %v1045_v54  ;;  %vm1208_vm7 = vcmask 1045509  }
 0x30c   : > { %v1056_v59 = vsel %vm1040_vm8, %v1030_v52, %v1048_v56  ;;  %vm1210_vm8 = vcmask 1046534   ;;  %vm1411_vm10 = vcmask 64512  }
 0x30d   : > { %v1060_v61 = vpack.c.bf16 %v1056_v59, %v1055_v58  ;;  %v1054_v62 = vsel %vm1038_vm9, %v1022_v55, %v1046_v57  ;;  %vm1212_vm9 = vcmask 1047559  }
 0x30e   : > { %v1059_v63 = vpack.c.bf16 %v1054_v62, %v1053_v60  ;;  %v2512_v60 = vsub.s32 7, %v2400_v4 }
 0x310   : > { %1931 = vmatprep.mubr.msk.bf16.mxu1 %vm1076_vm5, %v1059_v63  ;;  %v1319_v0 = vrot.slane %v2455_v10, %v2512_v60 }
 0x311   : > { %1932 = vmatmul.mubr.msk.bf16.gmra.mrb[12].mxu1 %vm1076_vm5, %v1060_v61 }
 0x3dc   : > { %v1929_v9 = vpop.f32.mrb[8].mxu1 }
 0x3dd   : > { %v1132_v15 = vadd.f32 %v1929_v9, %v1851_v8  ;;  %v1123_v16 = vpop.f32.mrb[9].mxu1  ;;  %v1255_v9 = vpop.permute.xlu1 %1254 }
 0x3de   : > { %v1124_v1 = vadd.f32 %v1851_v8, %v1123_v16  ;;  %v1930_v18 = vpop.f32.mrb[10].mxu1 }
 0x3df   : > { %vm1156_vm11 = vcmp.gt.f32.partialorder %v1132_v15, 0.0  ;;  %v1164_v19 = vmul.f32 0.01, %v1132_v15  ;;  %v1135_v21 = vadd.f32 %v1930_v18, %v1851_v8  ;;  %v1126_v23 = vpop.f32.mrb[11].mxu1 }
 0x3e0   : > { %vm1154_vm12 = vcmp.gt.f32.partialorder %v1124_v1, 0.0  ;;  %v1162_v25 = vmul.f32 0.01, %v1124_v1  ;;  %v1127_v26 = vadd.f32 %v1851_v8, %v1126_v23 }
 0x3e1   : > { %vm1157_vm13 = vcmp.gt.f32.partialorder %v1135_v21, 0.0  ;;  %v1165_v28 = vmul.f32 0.01, %v1135_v21  ;;  %v1172_v29 = vsel %vm1156_vm11, %v1132_v15, %v1164_v19  ;;  %v1280_v11 = vpop.permute.xlu1 %1279  ;;  %v1273_v15 = vpop.permute.xlu0 %1272 }
 0x3e2   : > { %v1163_v30 = vmul.f32 0.01, %v1127_v26  ;;  %v1217_v31 = vmul.f32 %v1200_v27, %v1172_v29  ;;  %v1170_v32 = vsel %vm1154_vm12, %v1124_v1, %v1162_v25  ;;  %vm1155_vm14 = vcmp.gt.f32.partialorder %v1127_v26, 0.0 }
 0x3e3   : > { %v1215_v33 = vmul.f32 %v1200_v27, %v1170_v32  ;;  %v1173_v34 = vsel %vm1157_vm13, %v1135_v21, %v1165_v28 }
 0x3e4   : > { %v1933_v35 = vpop.f32.mrb[12].mxu1  ;;  %v1229_v36 = vsel %vm1076_vm5, %v1217_v31, 0.0  ;;  %v1218_v40 = vmul.f32 %v1200_v27, %v1173_v34  ;;  %v1171_v43 = vsel %vm1155_vm14, %v1127_v26, %v1163_v30 }
 0x3e5   : > { %v1148_v37 = vadd.f32 %v1933_v35, %v1851_v8  ;;  %1230 = vadd.xlane.f32.xlu0 %v1229_v36  ;;  %v1139_v38 = vpop.f32.mrb[13].mxu1  ;;  %v1223_v39 = vsel %vm1076_vm5, %v1215_v33, 0.0  ;;  %v1216_v47 = vmul.f32 %v1200_v27, %v1171_v43  ;;  %v1287_v13 = vpop.permute.xlu1 %1286 }
 0x3e6   : > { %v1140_v41 = vadd.f32 %v1851_v8, %v1139_v38  ;;  %1224 = vadd.xlane.f32.xlu1 %v1223_v39  ;;  %v1934_v42 = vpop.f32.mrb[14].mxu1  ;;  %v1232_v46 = vsel %vm1076_vm5, %v1218_v40, 0.0  ;;  %v1308_v1 = vpop.permute.xlu0 %1307 }
 0x3e7   : > { %vm1160_vm15 = vcmp.gt.f32.partialorder %v1148_v37, 0.0  ;;  %v1168_v44 = vmul.f32 0.01, %v1148_v37  ;;  %v1142_v45 = vpop.f32.mrb[15].mxu1  ;;  %v1151_v49 = vadd.f32 %v1934_v42, %v1851_v8  ;;  %v1226_v51 = vsel %vm1076_vm5, %v1216_v47, 0.0 }
 0x3e8   : > { %v1166_v48 = vmul.f32 0.01, %v1140_v41  ;;  %vm1158_vm1 = vcmp.gt.f32.partialorder %v1140_v41, 0.0  ;;  %v1143_v54 = vadd.f32 %v1851_v8, %v1142_v45  ;;  %v1312_v8 = vrot.slane %v2455_v10, %v2520_v7 }
 0x3e9   : > { %v1176_v50 = vsel %vm1160_vm15, %v1148_v37, %v1168_v44  ;;  %v1169_v53 = vmul.f32 0.01, %v1151_v49  ;;  %vm1161_vm0 = vcmp.gt.f32.partialorder %v1151_v49, 0.0  ;;  %v1294_v16 = vpop.permute.xlu1 %1293 }
 0x3ea   : > { %1233 = vadd.xlane.f32.xlu1 %v1232_v46  ;;  %v1221_v52 = vmul.f32 %v1200_v27, %v1176_v50  ;;  %v1174_v55 = vsel %vm1158_vm1, %v1140_v41, %v1166_v48  ;;  %v1167_v58 = vmul.f32 0.01, %v1143_v54  ;;  %vm1159_vm2 = vcmp.gt.f32.partialorder %v1143_v54, 0.0 }
 0x3eb   : > { %v1219_v57 = vmul.f32 %v1200_v27, %v1174_v55  ;;  %v1177_v59 = vsel %vm1161_vm0, %v1151_v49, %v1169_v53 }
 0x3ec   : > { %v1241_v56 = vsel %vm1076_vm5, %v1221_v52, 0.0  ;;  %v1222_v62 = vmul.f32 %v1200_v27, %v1177_v59  ;;  %v1175_v63 = vsel %vm1159_vm2, %v1143_v54, %v1167_v58 }
 0x3ed   : > { %v1235_v61 = vsel %vm1076_vm5, %v1219_v57, 0.0  ;;  %v1220_v3 = vmul.f32 %v1200_v27, %v1175_v63  ;;  %v1301_v18 = vpop.permute.xlu1 %1300 }
 0x3ee   : > { %1227 = vadd.xlane.f32.xlu1 %v1226_v51  ;;  %v1244_v2 = vsel %vm1076_vm5, %v1222_v62, 0.0 }
 0x3ef   : > { %v1238_v6 = vsel %vm1076_vm5, %v1220_v3, 0.0  ;;  %vm1204_vm5 = vcmask 1043459  }
 0x3f2   : > { %1242 = vadd.xlane.f32.xlu1 %v1241_v56 }
 0x3f6   : > { %1236 = vadd.xlane.f32.xlu1 %v1235_v61 }
 0x3fa   : > { %1245 = vadd.xlane.f32.xlu1 %v1244_v2 }
 0x3fb   : > { %1321 = vbcast.lane.b32.xlu0 %v1319_v0, 256 }
 0x3fe   : > { %1239 = vadd.xlane.f32.xlu1 %v1238_v6 }
 0x40f   : > { %1314 = vbcast.lane.b32.xlu1 %v1312_v8, 256 }
 0x472   : > { %v1231_v19 = vpop.xlane.xlu0 %1230 }
 0x473   : > { %v1259_v21 = vadd.f32 %v1255_v9, %v1231_v19  ;;  %v1225_v23 = vpop.xlane.xlu1 %1224 }
 0x474   : > { %v1257_v26 = vadd.f32 %v1255_v9, %v1225_v23 }
 0x475   : > { %v2524_v25 = vsub.f32 %v1259_v21, %v1287_v13 }
 0x476   : > { %v2527_v28 = vsub.f32 %v1257_v26, %v1273_v15  ;;  %v1322_v42 = vpop.permute.xlu0 %1321 }
 0x477   : > { %v1234_v27 = vpop.xlane.xlu1 %1233  ;;  %1354 = vperm.xlu1 %2016, %v2524_v25  }
 0x478   : > { %v1260_v4 = vadd.f32 %v1255_v9, %v1234_v27 }
 0x47a   : > { %v2529_v10 = vsub.f32 %v1260_v4, %v1294_v16 }
 0x47b   : > { %v1228_v29 = vpop.xlane.xlu1 %1227  ;;  %1348 = vperm.xlu1 %2016, %v2527_v28  }
 0x47c   : > { %v1258_v30 = vadd.f32 %v1255_v9, %v1228_v29  ;;  %1357 = vperm.xlu0 %2015, %v2529_v10  }
 0x47e   : > { %v1332_v31 = vsub.f32 %v1258_v30, %v1280_v11 }
 0x47f   : > { %v1243_v32 = vpop.xlane.xlu1 %1242 }
 0x480   : > { %1351 = vperm.xlu0 %2015, %v1332_v31   ;;  %v1263_v39 = vadd.f32 %v1255_v9, %v1243_v32 }
 0x483   : > { %v1237_v33 = vpop.xlane.xlu1 %1236 }
 0x484   : > { %v1261_v34 = vadd.f32 %v1255_v9, %v1237_v33 }
 0x486   : > { %v2533_v35 = vsub.f32 %v1261_v34, %v1301_v18 }
 0x487   : > { %v1246_v36 = vpop.xlane.xlu1 %1245 }
 0x488   : > { %1360 = vperm.xlu1 %2016, %v2533_v35   ;;  %v1264_v40 = vadd.f32 %v1255_v9, %v1246_v36 }
 0x48a   : > { %v2541_v45 = vsub.f32 %v1264_v40, %v1322_v42 }
 0x48b   : > { %v1240_v37 = vpop.xlane.xlu1 %1239 }
 0x48c   : > { %v1262_v38 = vadd.f32 %v1255_v9, %v1240_v37 }
 0x48e   : > { %v2536_v41 = vsub.f32 %v1262_v38, %v1308_v1 }
 0x48f   : > { %v1315_v43 = vpop.permute.xlu1 %1314 }
 0x490   : > { %v2538_v44 = vsub.f32 %v1263_v39, %v1315_v43  ;;  %1363 = vperm.xlu0 %2015, %v2536_v41  }
 0x492   : > { %1366 = vperm.xlu1 %2016, %v2538_v44  }
 0x494   : > { %1369 = vperm.xlu0 %2015, %v2541_v45  }
 0x4f6   : > { %v1355_v47 = vpop.permute.xlu1 %1354 }
 0x4f7   : > { %v1382_v54 = vrot.slane %v1355_v47, %v2499_v5 }
 0x4fa   : > { %v1349_v49 = vpop.permute.xlu1 %1348 }
 0x4fb   : > { %v1358_v46 = vpop.permute.xlu0 %1357  ;;  %v1374_v51 = vrot.slane %v1349_v49, %v2499_v5 }
 0x4fc   : > { %v1386_v57 = vrot.slane %v1358_v46, %v2499_v5 }
 0x4ff   : > { %v1352_v48 = vpop.permute.xlu0 %1351 }
 0x500   : > { %v1378_v50 = vrot.slane %v1352_v48, %v2499_v5 }
 0x502   : > { %v1403_v52 = vsel %vm1201_vm3, %v1378_v50, %v1374_v51 }
 0x503   : > { %v1404_v55 = vsel %vm1202_vm4, %v1382_v54, %v1403_v52 }
 0x504   : > { %v1405_v59 = vsel %vm1204_vm5, %v1386_v57, %v1404_v55 }
 0x507   : > { %v1361_v53 = vpop.permute.xlu1 %1360 }
 0x508   : > { %v1390_v56 = vrot.slane %v1361_v53, %v2499_v5 }
 0x50a   : > { %v1406_v62 = vsel %vm1206_vm6, %v1390_v56, %v1405_v59 }
 0x50f   : > { %v1364_v58 = vpop.permute.xlu0 %1363 }
 0x510   : > { %v1394_v61 = vrot.slane %v1364_v58, %v2499_v5 }
 0x511   : > { %v1367_v63 = vpop.permute.xlu1 %1366 }
 0x512   : > { %v1407_v0 = vsel %vm1208_vm7, %v1394_v61, %v1406_v62  ;;  %v1398_v2 = vrot.slane %v1367_v63, %v2499_v5 }
 0x513   : > { %v1370_v3 = vpop.permute.xlu0 %1369 }
 0x514   : > { %v1402_v6 = vrot.slane %v1370_v3, %v2499_v5  ;;  %v1408_v8 = vsel %vm1210_vm8, %v1398_v2, %v1407_v0 }
 0x516   : > { %v1409_v9 = vsel %vm1212_vm9, %v1402_v6, %v1408_v8 }
 0x517   : > { %v1412_v11 = vsel %vm1411_vm10, %v1409_v9, -inf }
 0x518   : > { %1413 = vmax.xlane.f32.xlu1 %v1412_v11 }
 0x5a5   : > { %v1414_v13 = vpop.xlane.xlu1 %1413 }
 0x5a6   : > { %v1419_v15 = vrot.slane %v1414_v13, %v2414_v12  ;;  %v1423_v16 = vrot.slane %v1414_v13, %v2461_v14  ;;  %v1427_v1 = vrot.slane %v1414_v13, %v2466_v17  ;;  %v1431_v23 = vrot.slane %v1414_v13, %v2474_v20 }
 0x5a7   : > { %v1435_v4 = vrot.slane %v1414_v13, %v2484_v24  ;;  %v1439_v32 = vrot.slane %v1414_v13, %v2479_v22  ;;  %v1443_v34 = vrot.slane %v1414_v13, %v2520_v7 }
 0x5a8   : > { %v1456_v18 = vsub.f32 %v2527_v28, %v1419_v15  ;;  %v1457_v19 = vsub.f32 %v1332_v31, %v1423_v16  ;;  %v1458_v26 = vsub.f32 %v2524_v25, %v1427_v1  ;;  %v1459_v29 = vsub.f32 %v2529_v10, %v1431_v23 }
 0x5a9   : > { %v1460_v33 = vsub.f32 %v2533_v35, %v1435_v4  ;;  %v1461_v25 = vsub.f32 %v2536_v41, %v1439_v32  ;;  %v1447_v10 = vrot.slane %v1414_v13, %v2512_v60  ;;  %v1462_v38 = vsub.f32 %v2538_v44, %v1443_v34 }
 0x5aa   : > { %v1464_v21 = vmul.f32 1.442695, %v1456_v18  ;;  %v1466_v27 = vmul.f32 1.442695, %v1457_v19  ;;  %v1468_v30 = vmul.f32 1.442695, %v1458_v26 }
 0x5ab   : > { %v1470_v28 = vmul.f32 1.442695, %v1459_v29  ;;  %v1472_v36 = vmul.f32 1.442695, %v1460_v33  ;;  %v1474_v39 = vmul.f32 1.442695, %v1461_v25  ;;  %v1463_v35 = vsub.f32 %v2541_v45, %v1447_v10 }
 0x5ac   : > { %2025 = vpow2.f32 %v1464_v21  ;;  %v1476_v42 = vmul.f32 1.442695, %v1462_v38 }
 0x5ad   : > { %2027 = vpow2.f32 %v1466_v27  ;;  %v1478_v41 = vmul.f32 1.442695, %v1463_v35 }
 0x5ae   : > { %2029 = vpow2.f32 %v1468_v30 }
 0x5af   : > { %2031 = vpow2.f32 %v1470_v28 }
 0x5b0   : > { %2033 = vpow2.f32 %v1472_v36 }
 0x5b1   : > { %2035 = vpow2.f32 %v1474_v39 }
 0x5b2   : > { %2037 = vpow2.f32 %v1476_v42 }
 0x5b3   : > { %2039 = vpow2.f32 %v1478_v41 }
 0x5b6   : > { %v2026_v31 = vpop.eup %2025 }
 0x5b7   : > { %1489 = vperm.xlu0 %2015, %v2026_v31   ;;  %v2028_v37 = vpop.eup %2027 }
 0x5b8   : > { %v2030_v40 = vpop.eup %2029 }
 0x5b9   : > { %v2032_v43 = vpop.eup %2031 }
 0x5ba   : > { %v2034_v46 = vpop.eup %2033 }
 0x5bb   : > { %1492 = vperm.xlu0 %2015, %v2028_v37   ;;  %v2036_v47 = vpop.eup %2035 }
 0x5bc   : > { %v2038_v48 = vpop.eup %2037 }
 0x5bd   : > { %v2040_v44 = vpop.eup %2039 }
 0x5bf   : > { %1495 = vperm.xlu0 %2015, %v2030_v40  }
 0x5c3   : > { %1498 = vperm.xlu0 %2015, %v2032_v43  }
 0x5c7   : > { %1501 = vperm.xlu0 %2015, %v2034_v46  }
 0x5cb   : > { %1504 = vperm.xlu0 %2015, %v2036_v47  }
 0x5cf   : > { %1507 = vperm.xlu0 %2015, %v2038_v48  }
 0x5d3   : > { %1510 = vperm.xlu0 %2015, %v2040_v44  }
 0x636   : > { %v1490_v49 = vpop.permute.xlu0 %1489 }
 0x637   : > { %v1515_v56 = vrot.slane %v1490_v49, %v2499_v5 }
 0x63a   : > { %v1493_v50 = vpop.permute.xlu0 %1492 }
 0x63b   : > { %v1519_v54 = vrot.slane %v1493_v50, %v2499_v5 }
 0x63d   : > { %v1544_v61 = vsel %vm1201_vm3, %v1519_v54, %v1515_v56 }
 0x63e   : > { %v1496_v51 = vpop.permute.xlu0 %1495 }
 0x63f   : > { %v1523_v55 = vrot.slane %v1496_v51, %v2499_v5 }
 0x641   : > { %v1545_v63 = vsel %vm1202_vm4, %v1523_v55, %v1544_v61 }
 0x642   : > { %v1499_v52 = vpop.permute.xlu0 %1498 }
 0x643   : > { %v1527_v57 = vrot.slane %v1499_v52, %v2499_v5 }
 0x645   : > { %v1546_v2 = vsel %vm1204_vm5, %v1527_v57, %v1545_v63 }
 0x646   : > { %v1502_v45 = vpop.permute.xlu0 %1501 }
 0x647   : > { %v1531_v58 = vrot.slane %v1502_v45, %v2499_v5 }
 0x649   : > { %v1547_v3 = vsel %vm1206_vm6, %v1531_v58, %v1546_v2 }
 0x64a   : > { %v1505_v53 = vpop.permute.xlu0 %1504 }
 0x64b   : > { %v1535_v62 = vrot.slane %v1505_v53, %v2499_v5 }
 0x64d   : > { %v1548_v8 = vsel %vm1208_vm7, %v1535_v62, %v1547_v3 }
 0x64e   : > { %v1508_v59 = vpop.permute.xlu0 %1507 }
 0x64f   : > { %v1539_v0 = vrot.slane %v1508_v59, %v2499_v5 }
 0x651   : > { %v1549_v11 = vsel %vm1210_vm8, %v1539_v0, %v1548_v8 }
 0x652   : > { %v1511_v6 = vpop.permute.xlu0 %1510 }
 0x653   : > { %v1543_v9 = vrot.slane %v1511_v6, %v2499_v5 }
 0x655   : > { %v1550_v13 = vsel %vm1212_vm9, %v1543_v9, %v1549_v11 }
 0x656   : > { %v1552_v15 = vsel %vm1411_vm10, %v1550_v13, 0.0 }
 0x657   : > { %1553 = vadd.xlane.f32.xlu0 %v1552_v15 }
 0x6e4   : > { %v1554_v16 = vpop.xlane.xlu0 %1553 }
 0x6e5   : > { %2041 = vrcp.f32 %v1554_v16 }
 0x6ef   : > { %v2042_v1 = vpop.eup %2041 }
 0x6f0   : > { %v1580_v18 = vrot.slane %v2042_v1, %v2479_v22  ;;  %v1560_v19 = vrot.slane %v2042_v1, %v2414_v12  ;;  %v1564_v26 = vrot.slane %v2042_v1, %v2461_v14  ;;  %v1568_v4 = vrot.slane %v2042_v1, %v2466_v17 }
 0x6f1   : > { %v1572_v30 = vrot.slane %v2042_v1, %v2474_v20  ;;  %v1576_v22 = vrot.slane %v2042_v1, %v2484_v24  ;;  %v1584_v33 = vrot.slane %v2042_v1, %v2520_v7  ;;  %v1588_v28 = vrot.slane %v2042_v1, %v2512_v60 }
 0x6f2   : > { %v1602_v21 = vmul.f32 %v2036_v47, %v1580_v18  ;;  %v1597_v23 = vmul.f32 %v2026_v31, %v1560_v19  ;;  %v1598_v27 = vmul.f32 %v2028_v37, %v1564_v26  ;;  %v1599_v29 = vmul.f32 %v2030_v40, %v1568_v4 }
 0x6f3   : > { %v1600_v32 = vmul.f32 %v2032_v43, %v1572_v30  ;;  %v1601_v12 = vmul.f32 %v2034_v46, %v1576_v22  ;;  %v1603_v14 = vmul.f32 %v2038_v48, %v1584_v33  ;;  %v1604_v31 = vmul.f32 %v2040_v44, %v1588_v28 }
 0x6f4   : > { %1629 = vperm.xlu0 %2015, %v1602_v21   ;;  %1614 = vperm.xlu1 %2016, %v1597_v23  }
 0x6f8   : > { %1617 = vperm.xlu1 %2016, %v1598_v27  }
 0x6fc   : > { %1620 = vperm.xlu1 %2016, %v1599_v29  }
 0x700   : > { %1623 = vperm.xlu1 %2016, %v1600_v32  }
 0x704   : > { %1626 = vperm.xlu1 %2016, %v1601_v12  }
 0x708   : > { %1632 = vperm.xlu1 %2016, %v1603_v14  }
 0x70c   : > { %1635 = vperm.xlu1 %2016, %v1604_v31  }
 0x773   : > { %v1615_v17 = vpop.permute.xlu1 %1614  ;;  %v1630_v39 = vpop.permute.xlu0 %1629 }
 0x774   : > { %v1640_v7 = vrot.slane %v1615_v17, %v2499_v5  ;;  %v1660_v46 = vrot.slane %v1630_v39, %v2499_v5 }
 0x777   : > { %v1618_v34 = vpop.permute.xlu1 %1617 }
 0x778   : > { %v1644_v36 = vrot.slane %v1618_v34, %v2499_v5 }
 0x77a   : > { %v1669_v38 = vsel %vm1201_vm3, %v1644_v36, %v1640_v7 }
 0x77b   : > { %v1621_v25 = vpop.permute.xlu1 %1620 }
 0x77c   : > { %v1648_v24 = vrot.slane %v1621_v25, %v2499_v5 }
 0x77e   : > { %v1670_v40 = vsel %vm1202_vm4, %v1648_v24, %v1669_v38 }
 0x77f   : > { %v1624_v20 = vpop.permute.xlu1 %1623 }
 0x780   : > { %v1652_v10 = vrot.slane %v1624_v20, %v2499_v5 }
 0x782   : > { %v1671_v42 = vsel %vm1204_vm5, %v1652_v10, %v1670_v40 }
 0x783   : > { %v1627_v37 = vpop.permute.xlu1 %1626 }
 0x784   : > { %v1656_v60 = vrot.slane %v1627_v37, %v2499_v5 }
 0x786   : > { %v1672_v43 = vsel %vm1206_vm6, %v1656_v60, %v1671_v42 }
 0x787   : > { %v1633_v35 = vpop.permute.xlu1 %1632  ;;  %v1673_v48 = vsel %vm1208_vm7, %v1660_v46, %v1672_v43 }
 0x788   : > { %v1664_v41 = vrot.slane %v1633_v35, %v2499_v5 }
 0x78a   : > { %v1674_v49 = vsel %vm1210_vm8, %v1664_v41, %v1673_v48 }
 0x78b   : > { %v1636_v47 = vpop.permute.xlu1 %1635 }
 0x78c   : > { %v1668_v44 = vrot.slane %v1636_v47, %v2499_v5 }
 0x78e   : > { %v1675_v50 = vsel %vm1212_vm9, %v1668_v44, %v1674_v49 }
 0x78f   : > { %1677 = vst.msk [vmem:[%s519_s15] sm:$0xff] %vm1411_vm10, %v1675_v50 }
 0x790   : > { %2112 = shalt.err (!%p2109_p6)
}
 0x791   : > { %s2113_s25 = scalar_lea.hbm %s2619_s14, 128  ;;  %s2117_s13 = scalar_lea.hbm %s2710_s17, 256 }
 0x792   : > { %p2114_p7 = scmp.ne.s32.totalorder %s2619_s14, %s2113_s25  ;;  %p2118_p0 = scmp.lt.u32.totalorder %s2619_s14, %s2710_s17 }
 0x793   : > { %p2119_p4 = scmp.lt.u32.totalorder %s2117_s13, %s2113_s25  ;;  %p2121_p13 = scmp.lt.u32.totalorder %s2113_s25, %s2619_s14 }
 0x794   : > { %p2115_p9 = pnand %p2114_p7, %p2711_p8 }
 0x795   : > { %p2120_p1 = por %p2119_p4, %p2118_p0 }
 0x796   : > { %p2116_p12 = pneg %p2115_p9 }
 0x797   : > { %p2122_p10 = por %p2121_p13, %p2120_p1 }
 0x799   : > { %p2123_p11 = pnand %p2122_p10, %p2116_p12 }
 0x79b   : > { %2126 = shalt.err (!%p2123_p11)
}
 0x79c   : > { %1943 = dma.vmem_to_hbm [thread:$0]  (%p2711_p8), %s2621_s16, 128, %s2619_s14, %s1679_s30  }
 0x79d PF: > { %s2712_s20 = sld [smem:[#allocation15_spill]]  ;;  %s2713_s24 = sld [smem:[#allocation12_spill]] }
 0x79e   : > { %s2714_s29 = sld [smem:[#allocation17_spill]] }
 0x7a3   : > { %p1960_p2 = scmp.ge.s32.totalorder %s2712_s20, 2  ;;  %s1705_s23 = sand.u32 1, %s2713_s24  }
 0x7a4   : > { %p2715_p3 = scmp.ne.s32.totalorder %s2714_s29, 0  ;;  %s1706_s21 = scalar_lea.sflag [#allocation5], %s1705_s23 }
 0x7a6   : > { %p1953_p5 = pnand %p1960_p2, %p2715_p3 }
 0x7a8   : > { %2160 = dma.done.wait (!%p1953_p5), %s1706_s21, 128  }
 0x7a9   : > { %2162 = vsyncadd (!%p1953_p5), %s1706_s21, 4294967168  ;;  %s30_s15 = sadd.s32 1, %s2712_s20   ;;  %s2716_s22 = sld [smem:[#allocation13_spill]] }
 0x7aa   : > { %p27_p6 = scmp.ge.s32.totalorder %s30_s15, 4   ;;  %s2717_s29 = sld [smem:[#allocation18_spill]] }
 0x7ab   : > { %s2718_s30 = sld [smem:[#allocation14_spill]]  ;;  %s2719_s14 = sld [smem:[#allocation16_spill]] }
 0x7ac   : > { %s2720_s27 = smov %s2169_s28  ;;  %29 = sbr.rel (!%p27_p6) target bundleno = 9 (0x9), region = 122 }
 0x7af   : > { %s2721_s28 = smov %s2716_s22 }
 0x7b3   :  { %1711 = vsyncpa [#allocation4], 1 }
 0x7b4   :  { %1713 = vsyncpa [#allocation4 + $0x1], 1 }
 0x7b5   :  { %1714 = vsyncpa [#allocation7], 1 }
 0x7b6   :  { %1715 = vsyncpa [#allocation5], 1 }
 0x7b7   :  { %1717 = vsyncpa [#allocation5 + $0x1], 1 }

</bundles_post_ra>
